<compile_context>
chip_gen: v7x
topology: tpu7x:2x2x1
jax: 0.10.0
libtpu: 0.0.40
codegen_flags: <defaults>
</compile_context>

<pallas_src>
import jax
import jax.numpy as jnp
from jax.experimental import pallas as pl
from jax.experimental.pallas import tpu as pltpu

_LANE = 128
_SUBLANE = 8


def _slam_loss_kernel(d_ref, v_ref, u_ref, t_ref, m_ref, out_ref):
    d = d_ref[...].astype(jnp.float32)
    v = v_ref[...].astype(jnp.float32)
    u = u_ref[...].astype(jnp.float32)
    t = t_ref[...].astype(jnp.float32)

    # valid = (mask > 0), mask may be bool / int8 / float.  Upcast-then-compare
    # keeps the lowering uniform across dtypes.
    valid = m_ref[...].astype(jnp.float32) > 0.0
    y = valid.astype(jnp.float32)

    # F.binary_cross_entropy (sum here, mean in wrapper).  y is exactly 0/1,
    # so -(y*log(v) + (1-y)*log(1-v)) collapses to a single clamped log
    # (PyTorch clamps each log term at -100).  NOTE: relies on a hard 0/1
    # mask; not valid for soft/float labels.
    bce = -jnp.maximum(jnp.log(jnp.where(valid, v, 1.0 - v)), -100.0)

    # Weighted distance term on valid entries.
    err = (d - t) * (d - t)
    wdl = err * jnp.exp(-u) + 0.5 * u

    bce_sum = jnp.sum(bce)
    wdl_sum = jnp.sum(jnp.where(valid, wdl, 0.0))
    n_valid = jnp.sum(y)
    inv_sum = jnp.sum(jnp.where(valid, 0.0, jnp.abs(d)))

    # Lane-dense (8,128) partial-sum tile: sublane k broadcast-holds sum k.
    # Full-vreg unmasked store, no init branch, no cross-iteration state.
    row = jax.lax.broadcasted_iota(jnp.int32, (8, 128), 0)
    tile = jnp.where(row == 0, bce_sum,
           jnp.where(row == 1, wdl_sum,
           jnp.where(row == 2, n_valid,
           jnp.where(row == 3, inv_sum, 0.0))))
    out_ref[0] = tile


def _vmem_budgets():
    """Generation-aware (input-double-buffer budget, vmem_limit_bytes)."""
    try:
        cap = getattr(pltpu.get_tpu_info(), "vmem_capacity_bytes", None)
    except Exception:
        cap = None
    if cap is not None and cap > 96 * 1024 * 1024:
        # v5e / v6e class: 128 MiB VMEM — roomy.
        return 24 * 1024 * 1024, 64 * 1024 * 1024
    # v7x class (64 MiB/TC) or unknown: conservative, safe everywhere.
    return 16 * 1024 * 1024, 40 * 1024 * 1024


def _rows_per_block(total_rows, vmem_budget_bytes):
    """Largest row-block (multiple of 8) whose five double-buffered f32 input
    blocks fit the budget; clipped to the actual problem size."""
    bytes_per_row = 5 * 2 * _LANE * 4          # 5 inputs x 2 buffers x f32
    budget_rows = max(_SUBLANE,
                      (vmem_budget_bytes // bytes_per_row) // _SUBLANE * _SUBLANE)
    rows = min(budget_rows, total_rows)
    rows = ((rows + _SUBLANE - 1) // _SUBLANE) * _SUBLANE
    return rows


def slam_optimized_loss(predictions, targets, target_mask):
    raw_distances = predictions['raw_distances']
    validity = predictions['validity']
    uncertainty = predictions['uncertainty']

    n_true = raw_distances.size                      # true element count
    total_rows = pl.cdiv(n_true, _LANE)
    vmem_budget, vmem_limit = _vmem_budgets()
    rows = _rows_per_block(total_rows, vmem_budget)
    grid_m = pl.cdiv(total_rows, rows)
    padded_rows = grid_m * rows
    n_pad = padded_rows * _LANE

    def _flat(x):
        # Zero padding is neutral for every partial sum:
        #   mask=0 -> not valid (no wdl / n_valid), validity=0 -> bce term 0,
        #   d=0 -> |d|=0; #invalid is derived from n_true, not n_pad.
        x = x.reshape(-1)
        if n_pad != n_true:
            x = jnp.pad(x, (0, n_pad - n_true))
        return x.reshape(padded_rows, _LANE)

    args = (_flat(raw_distances), _flat(validity), _flat(uncertainty),
            _flat(targets), _flat(target_mask))

    in_spec = pl.BlockSpec((rows, _LANE), lambda i: (i, 0))
    out_spec = pl.BlockSpec((1, 8, 128), lambda i: (i, 0, 0))

    partials = pl.pallas_call(
        _slam_loss_kernel,
        out_shape=jax.ShapeDtypeStruct((grid_m, 8, 128), jnp.float32),
        grid_spec=pltpu.PrefetchScalarGridSpec(
            num_scalar_prefetch=0,
            grid=(grid_m,),
            in_specs=[in_spec] * 5,
            out_specs=out_spec,
        ),
        compiler_params=pltpu.CompilerParams(
            # TODO(synk): on v7x, verify both TensorCores pick up this axis;
            # if not, switch to pltpu.CORE_PARALLEL.
            dimension_semantics=("parallel",),
            vmem_limit_bytes=vmem_limit,
        ),
    )(*args)

    # Tiny final reduce + edge-case handling in plain JAX.
    sums = jnp.sum(partials[:, :4, 0], axis=0)        # (4,)
    bce_sum, wdl_sum, n_valid, inv_sum = sums[0], sums[1], sums[2], sums[3]

    total_elems = jnp.float32(n_true)
    n_invalid = total_elems - n_valid                  # mask is 0/1

    validity_loss = bce_sum / total_elems
    distance_loss = jnp.where(n_valid > 0.0,
                              wdl_sum / jnp.maximum(n_valid, 1.0), 0.0)
    invalid_pred_loss = jnp.where(n_invalid > 0.0,
                                  inv_sum / jnp.maximum(n_invalid, 1.0), 0.0)
    total_loss = distance_loss + validity_loss + 0.1 * invalid_pred_loss
    return total_loss, {
        'distance_loss': distance_loss,
        'validity_loss': validity_loss,
        'invalid_pred_loss': invalid_pred_loss,
    }


if __name__ == "__main__":
    key = jax.random.PRNGKey(0)
    k1, k2, k3, k4, k5 = jax.random.split(key, 5)

    M, N = 16, 256  # small measurement grid

    raw_distances = jax.random.normal(k1, (M, N), dtype=jnp.float32) * 2.0
    validity = jax.nn.sigmoid(jax.random.normal(k2, (M, N), dtype=jnp.float32))
    uncertainty = jax.random.normal(k3, (M, N), dtype=jnp.float32) * 0.5
    targets = jax.random.normal(k4, (M, N), dtype=jnp.float32) * 2.0
    # int8 mask: 17 instead of 20 HBM bytes/element on the dominant read path.
    target_mask = (jax.random.uniform(k5, (M, N)) < 0.7).astype(jnp.int8)

    predictions = {
        'raw_distances': raw_distances,
        'validity': validity,
        'uncertainty': uncertainty,
    }

    total_loss, aux = slam_optimized_loss(predictions, targets, target_mask)
    total_loss = jax.block_until_ready(total_loss)
    jax.block_until_ready(aux['distance_loss'])
    jax.block_until_ready(aux['validity_loss'])
    jax.block_until_ready(aux['invalid_pred_loss'])

    print("KERNEL_OK")
</pallas_src>

<mosaic_0001>
module attributes {stable_mosaic.version = 11 : i64} {
  func.func @_slam_loss_kernel(%arg0: i32, %arg1: memref<32x128xf32, #tpu.memory_space<vmem>>, %arg2: memref<32x128xf32, #tpu.memory_space<vmem>>, %arg3: memref<32x128xf32, #tpu.memory_space<vmem>>, %arg4: memref<32x128xf32, #tpu.memory_space<vmem>>, %arg5: memref<32x128xi8, #tpu.memory_space<vmem>>, %arg6: memref<1x8x128xf32, #tpu.memory_space<vmem>>) attributes {dimension_semantics = [#tpu.dimension_semantics<parallel>], iteration_bounds = array<i64: 1>, scalar_prefetch = 0 : i64, scratch_operands = 0 : i64, tpu.core_type = #tpu.core_type<tc>, window_params = [{transform_indices = @transform_0, window_bounds = array<i64: 32, 128>}, {transform_indices = @transform_1, window_bounds = array<i64: 32, 128>}, {transform_indices = @transform_2, window_bounds = array<i64: 32, 128>}, {transform_indices = @transform_3, window_bounds = array<i64: 32, 128>}, {transform_indices = @transform_4, window_bounds = array<i64: 32, 128>}, {transform_indices = @transform_5, window_bounds = array<i64: 1, 8, 128>}]} {
    %c0 = arith.constant 0 : index
    %c0_0 = arith.constant 0 : index
    %0 = vector.load %arg1[%c0, %c0_0] : memref<32x128xf32, #tpu.memory_space<vmem>>, vector<32x128xf32>
    %c0_1 = arith.constant 0 : index
    %c0_2 = arith.constant 0 : index
    %1 = vector.load %arg2[%c0_1, %c0_2] : memref<32x128xf32, #tpu.memory_space<vmem>>, vector<32x128xf32>
    %c0_3 = arith.constant 0 : index
    %c0_4 = arith.constant 0 : index
    %2 = vector.load %arg3[%c0_3, %c0_4] : memref<32x128xf32, #tpu.memory_space<vmem>>, vector<32x128xf32>
    %c0_5 = arith.constant 0 : index
    %c0_6 = arith.constant 0 : index
    %3 = vector.load %arg4[%c0_5, %c0_6] : memref<32x128xf32, #tpu.memory_space<vmem>>, vector<32x128xf32>
    %c0_7 = arith.constant 0 : index
    %c0_8 = arith.constant 0 : index
    %4 = vector.load %arg5[%c0_7, %c0_8] : memref<32x128xi8, #tpu.memory_space<vmem>>, vector<32x128xi8>
    %5 = arith.sitofp %4 : vector<32x128xi8> to vector<32x128xf32>
    %cst = arith.constant 0.000000e+00 : f32
    %6 = vector.broadcast %cst : f32 to vector<32x128xf32>
    %7 = arith.cmpf ogt, %5, %6 : vector<32x128xf32>
    %8 = arith.extui %7 : vector<32x128xi1> to vector<32x128xi32>
    %9 = arith.sitofp %8 : vector<32x128xi32> to vector<32x128xf32>
    %cst_9 = arith.constant 1.000000e+00 : f32
    %10 = vector.broadcast %cst_9 : f32 to vector<32x128xf32>
    %11 = arith.subf %10, %1 : vector<32x128xf32>
    %12 = arith.select %7, %1, %11 : vector<32x128xi1>, vector<32x128xf32>
    %13 = math.log %12 : vector<32x128xf32>
    %cst_10 = arith.constant -1.000000e+02 : f32
    %14 = vector.broadcast %cst_10 : f32 to vector<32x128xf32>
    %15 = arith.maximumf %13, %14 : vector<32x128xf32>
    %cst_11 = arith.constant 0.000000e+00 : f32
    %16 = vector.broadcast %cst_11 : f32 to vector<32x128xf32>
    %17 = arith.subf %16, %15 : vector<32x128xf32>
    %18 = arith.subf %0, %3 : vector<32x128xf32>
    %19 = arith.subf %0, %3 : vector<32x128xf32>
    %20 = arith.mulf %18, %19 : vector<32x128xf32>
    %cst_12 = arith.constant 0.000000e+00 : f32
    %21 = vector.broadcast %cst_12 : f32 to vector<32x128xf32>
    %22 = arith.subf %21, %2 : vector<32x128xf32>
    %23 = math.exp %22 : vector<32x128xf32>
    %24 = arith.mulf %20, %23 : vector<32x128xf32>
    %cst_13 = arith.constant 5.000000e-01 : f32
    %25 = vector.broadcast %cst_13 : f32 to vector<32x128xf32>
    %26 = arith.mulf %25, %2 : vector<32x128xf32>
    %27 = arith.addf %24, %26 : vector<32x128xf32>
    %28 = vector.shape_cast %17 : vector<32x128xf32> to vector<1x32x128xf32>
    %cst_14 = arith.constant dense<0.000000e+00> : vector<1xf32>
    %29 = vector.multi_reduction <add>, %28, %cst_14 [1, 2] : vector<1x32x128xf32> to vector<1xf32>
    %30 = vector.shape_cast %29 : vector<1xf32> to vector<1x1x1xf32>
    %31 = vector.extract %30[0, 0, 0] : f32 from vector<1x1x1xf32>
    %cst_15 = arith.constant 0.000000e+00 : f32
    %32 = vector.broadcast %cst_15 : f32 to vector<32x128xf32>
    %33 = arith.select %7, %27, %32 : vector<32x128xi1>, vector<32x128xf32>
    %34 = vector.shape_cast %33 : vector<32x128xf32> to vector<1x32x128xf32>
    %cst_16 = arith.constant dense<0.000000e+00> : vector<1xf32>
    %35 = vector.multi_reduction <add>, %34, %cst_16 [1, 2] : vector<1x32x128xf32> to vector<1xf32>
    %36 = vector.shape_cast %35 : vector<1xf32> to vector<1x1x1xf32>
    %37 = vector.extract %36[0, 0, 0] : f32 from vector<1x1x1xf32>
    %38 = vector.shape_cast %9 : vector<32x128xf32> to vector<1x32x128xf32>
    %cst_17 = arith.constant dense<0.000000e+00> : vector<1xf32>
    %39 = vector.multi_reduction <add>, %38, %cst_17 [1, 2] : vector<1x32x128xf32> to vector<1xf32>
    %40 = vector.shape_cast %39 : vector<1xf32> to vector<1x1x1xf32>
    %41 = vector.extract %40[0, 0, 0] : f32 from vector<1x1x1xf32>
    %42 = math.absf %0 : vector<32x128xf32>
    %cst_18 = arith.constant 0.000000e+00 : f32
    %43 = vector.broadcast %cst_18 : f32 to vector<32x128xf32>
    %44 = arith.select %7, %43, %42 : vector<32x128xi1>, vector<32x128xf32>
    %45 = vector.shape_cast %44 : vector<32x128xf32> to vector<1x32x128xf32>
    %cst_19 = arith.constant dense<0.000000e+00> : vector<1xf32>
    %46 = vector.multi_reduction <add>, %45, %cst_19 [1, 2] : vector<1x32x128xf32> to vector<1xf32>
    %47 = vector.shape_cast %46 : vector<1xf32> to vector<1x1x1xf32>
    %48 = vector.extract %47[0, 0, 0] : f32 from vector<1x1x1xf32>
    %49 = tpu.iota {dimensions = array<i32: 0>} : vector<8x128xi32>
    %c0_i32 = arith.constant 0 : i32
    %50 = vector.broadcast %c0_i32 : i32 to vector<8x128xi32>
    %51 = arith.cmpi eq, %49, %50 : vector<8x128xi32>
    %c1_i32 = arith.constant 1 : i32
    %52 = vector.broadcast %c1_i32 : i32 to vector<8x128xi32>
    %53 = arith.cmpi eq, %49, %52 : vector<8x128xi32>
    %c2_i32 = arith.constant 2 : i32
    %54 = vector.broadcast %c2_i32 : i32 to vector<8x128xi32>
    %55 = arith.cmpi eq, %49, %54 : vector<8x128xi32>
    %c3_i32 = arith.constant 3 : i32
    %56 = vector.broadcast %c3_i32 : i32 to vector<8x128xi32>
    %57 = arith.cmpi eq, %49, %56 : vector<8x128xi32>
    %cst_20 = arith.constant 0.000000e+00 : f32
    %58 = vector.broadcast %48 : f32 to vector<8x128xf32>
    %59 = vector.broadcast %cst_20 : f32 to vector<8x128xf32>
    %60 = arith.select %57, %58, %59 : vector<8x128xi1>, vector<8x128xf32>
    %61 = vector.broadcast %41 : f32 to vector<8x128xf32>
    %62 = arith.select %55, %61, %60 : vector<8x128xi1>, vector<8x128xf32>
    %63 = vector.broadcast %37 : f32 to vector<8x128xf32>
    %64 = arith.select %53, %63, %62 : vector<8x128xi1>, vector<8x128xf32>
    %65 = vector.broadcast %31 : f32 to vector<8x128xf32>
    %66 = arith.select %51, %65, %64 : vector<8x128xi1>, vector<8x128xf32>
    %c0_21 = arith.constant 0 : index
    %c0_22 = arith.constant 0 : index
    %c0_23 = arith.constant 0 : index
    %67 = vector.load %arg6[%c0_21, %c0_22, %c0_23] : memref<1x8x128xf32, #tpu.memory_space<vmem>>, vector<1x8x128xf32>
    %68 = vector.shape_cast %67 : vector<1x8x128xf32> to vector<8x128xf32>
    %69 = vector.shape_cast %66 : vector<8x128xf32> to vector<1x8x128xf32>
    tpu.vector_store %arg6[%c0_21, %c0_22, %c0_23], %69 {strides = array<i32>} : memref<1x8x128xf32, #tpu.memory_space<vmem>>, vector<1x8x128xf32>,
    return
  }
  func.func @transform_0(%arg0: i32) -> (i32, i32) {
    %c0_i32 = arith.constant 0 : i32
    %c0_i32_0 = arith.constant 0 : i32
    return %arg0, %c0_i32 : i32, i32
  }
  func.func @transform_1(%arg0: i32) -> (i32, i32) {
    %c0_i32 = arith.constant 0 : i32
    %c0_i32_0 = arith.constant 0 : i32
    return %arg0, %c0_i32 : i32, i32
  }
  func.func @transform_2(%arg0: i32) -> (i32, i32) {
    %c0_i32 = arith.constant 0 : i32
    %c0_i32_0 = arith.constant 0 : i32
    return %arg0, %c0_i32 : i32, i32
  }
  func.func @transform_3(%arg0: i32) -> (i32, i32) {
    %c0_i32 = arith.constant 0 : i32
    %c0_i32_0 = arith.constant 0 : i32
    return %arg0, %c0_i32 : i32, i32
  }
  func.func @transform_4(%arg0: i32) -> (i32, i32) {
    %c0_i32 = arith.constant 0 : i32
    %c0_i32_0 = arith.constant 0 : i32
    return %arg0, %c0_i32 : i32, i32
  }
  func.func @transform_5(%arg0: i32) -> (i32, i32, i32) {
    %c0_i32 = arith.constant 0 : i32
    %c0_i32_0 = arith.constant 0 : i32
    %c0_i32_1 = arith.constant 0 : i32
    return %arg0, %c0_i32, %c0_i32_0 : i32, i32, i32
  }
}

</mosaic_0001>

<bundles_post_ra>
// kernel: tpu_custom_call.1
= control target key start
LH: loop header
LB: loop body
LE: loop exit
PB: predicated region body
PF: predicated region fallthrough
CT: control target
= control target key end

     0   :  { %10 = vsyncpa [#allocation3], 0  ;;  %s594_s0 = inlined_call_operand.hbm [shape: f32[32,128], index: 0, kind: input, shape index: {}]   ;;  %s595_s1 = inlined_call_operand.hbm [shape: f32[32,128], index: 1, kind: input, shape index: {}]   ;;  %s596_s2 = inlined_call_operand.hbm [shape: f32[32,128], index: 2, kind: input, shape index: {}]   ;;  %s597_s3 = inlined_call_operand.hbm [shape: f32[32,128], index: 3, kind: input, shape index: {}]   ;;  %s598_s4 = inlined_call_operand.vmem [shape: s8[32,128], index: 4, kind: input, shape index: {}]   ;;  %s599_s5 = inlined_call_operand.hbm [shape: f32[1,8,128], index: 5, kind: output, shape index: {}]  }
   0x1   :  { %11 = vsyncpa [#allocation6], 0 }
   0x2   :  { %12 = vsyncpa [#allocation9], 0 }
   0x3   :  { %13 = vsyncpa [#allocation4], 0  ;;  %s415_s18 = smov [#allocation5]   ;;  %s416_s20 = smov [#allocation2]  }
   0x4   :  { %s31_s19 = sshll.u32 %s415_s18, 4  ;;  %s19_s21 = sshll.u32 %s416_s20, 4  ;;  %s32_s19 = int_to_ptr.vmem [resolvable:$true] %s31_s19  ;;  %s453_s21 = int_to_ptr.vmem [resolvable:$true] %s19_s21 }
   0x5   :  { %s297_s24 = scalar_lea.hbm %s595_s1, 512 }
   0x6   :  { %p298_p0 = scmp.ne.s32.totalorder %s595_s1, %s297_s24  ;;  %p301_p1 = scmp.lt.u32.totalorder %s297_s24, %s595_s1 }
   0x8   :  { %p303_p2 = pnand %p301_p1, %p298_p0 }
   0xa   :  { %306 = shalt.err (!%p303_p2)
}
   0xb   :  { %s307_s29 = scalar_lea.vmem %s32_s19, 512  ;;  %p312_p4 = scmp.lt.s32.totalorder %s32_s19, %s32_s19 }
   0xc   :  { %p308_p3 = scmp.ne.s32.totalorder %s32_s19, %s307_s29  ;;  %p313_p5 = scmp.lt.s32.totalorder %s307_s29, %s307_s29 }
   0xe   :  { %p314_p6 = por %p313_p5, %p312_p4 }
  0x10   :  { %p315_p7 = pnand %p314_p6, %p308_p3 }
  0x12   :  { %318 = shalt.err (!%p315_p7)
}
  0x13   :  { %s417_s30 = smov 128   ;;  %s418_s6 = smov 8  }
  0x14   :  { %37 = dma.hbm_to_vmem [thread:$0]  %s595_s1, 512, %s32_s19, [#allocation6], %s417_s30, %s417_s30, %s418_s6  }
  0x15   :  { %s319_s11 = scalar_lea.hbm %s594_s0, 512 }
  0x16   :  { %p320_p8 = scmp.ne.s32.totalorder %s594_s0, %s319_s11  ;;  %p323_p9 = scmp.lt.u32.totalorder %s319_s11, %s594_s0 }
  0x18   :  { %p325_p10 = pnand %p323_p9, %p320_p8 }
  0x1a   :  { %328 = shalt.err (!%p325_p10)
}
  0x1b   :  { %s329_s16 = scalar_lea.vmem %s453_s21, 512  ;;  %p334_p12 = scmp.lt.s32.totalorder %s453_s21, %s453_s21 }
  0x1c   :  { %p330_p11 = scmp.ne.s32.totalorder %s453_s21, %s329_s16  ;;  %p335_p13 = scmp.lt.s32.totalorder %s329_s16, %s329_s16 }
  0x1e   :  { %p336_p0 = por %p335_p13, %p334_p12 }
  0x20   :  { %p337_p1 = pnand %p336_p0, %p330_p11 }
  0x22   :  { %340 = shalt.err (!%p337_p1)
}
  0x23   :  { %25 = dma.hbm_to_vmem [thread:$0]  %s594_s0, 512, %s453_s21, [#allocation3], %s417_s30, %s417_s30, %s418_s6  }
  0x24   :  { %s419_s18 = smov [#allocation7]   ;;  %s420_s20 = smov [#allocation8]  }
  0x25   :  { %s43_s19 = sshll.u32 %s419_s18, 4  ;;  %s55_s22 = sshll.u32 %s420_s20, 4  ;;  %s44_s19 = int_to_ptr.vmem [resolvable:$true] %s43_s19  ;;  %s490_s22 = int_to_ptr.vmem [resolvable:$true] %s55_s22 }
  0x26   :  { %s341_s25 = scalar_lea.hbm %s596_s2, 512 }
  0x27   :  { %p342_p2 = scmp.ne.s32.totalorder %s596_s2, %s341_s25  ;;  %p345_p3 = scmp.lt.u32.totalorder %s341_s25, %s596_s2 }
  0x29   :  { %p347_p4 = pnand %p345_p3, %p342_p2 }
  0x2b   :  { %350 = shalt.err (!%p347_p4)
}
  0x2c   :  { %s351_s0 = scalar_lea.vmem %s44_s19, 512  ;;  %p356_p6 = scmp.lt.s32.totalorder %s44_s19, %s44_s19 }
  0x2d   :  { %p352_p5 = scmp.ne.s32.totalorder %s44_s19, %s351_s0  ;;  %p357_p7 = scmp.lt.s32.totalorder %s351_s0, %s351_s0 }
  0x2f   :  { %p358_p8 = por %p357_p7, %p356_p6 }
  0x31   :  { %p359_p9 = pnand %p358_p8, %p352_p5 }
  0x33   :  { %362 = shalt.err (!%p359_p9)
}
  0x34   :  { %49 = dma.hbm_to_vmem [thread:$0]  %s596_s2, 512, %s44_s19, [#allocation6], %s417_s30, %s417_s30, %s418_s6  }
  0x35   :  { %s363_s10 = scalar_lea.hbm %s597_s3, 512 }
  0x36   :  { %p364_p10 = scmp.ne.s32.totalorder %s597_s3, %s363_s10  ;;  %p367_p11 = scmp.lt.u32.totalorder %s363_s10, %s597_s3 }
  0x38   :  { %p369_p12 = pnand %p367_p11, %p364_p10 }
  0x3a   :  { %372 = shalt.err (!%p369_p12)
}
  0x3b   :  { %s373_s15 = scalar_lea.vmem %s490_s22, 512  ;;  %p378_p0 = scmp.lt.s32.totalorder %s490_s22, %s490_s22 }
  0x3c   :  { %p374_p13 = scmp.ne.s32.totalorder %s490_s22, %s373_s15  ;;  %p379_p1 = scmp.lt.s32.totalorder %s373_s15, %s373_s15 }
  0x3e   :  { %p380_p2 = por %p379_p1, %p378_p0 }
  0x40   :  { %p381_p3 = pnand %p380_p2, %p374_p13 }
  0x42   :  { %384 = shalt.err (!%p381_p3)
}
  0x43   :  { %61 = dma.hbm_to_vmem [thread:$0]  %s597_s3, 512, %s490_s22, [#allocation9], %s417_s30, %s417_s30, %s418_s6  }
  0x44   :  { %407 = dma.done.wait [#allocation3], 512  }
  0x45   :  { %408 = vsyncadd [#allocation3], 4294966784 }
  0x46   :  { %409 = dma.done.wait [#allocation6], 1024  }
  0x47   :  { %410 = vsyncadd [#allocation6], 4294966272 }
  0x48   :  { %411 = dma.done.wait [#allocation9], 512  }
  0x49   :  { %412 = vsyncadd [#allocation9], 4294966784  ;;  %v92_v0 = vld [vmem:[%s598_s4] sm:$0xff]  ;;  %v532_v6 = vld [vmem:[#allocation2 + $0x8] sm:$0xff]  ;;  %v421_v15 = vmov 0.0   ;;  %s422_s18 = smov [#allocation10]  }
  0x4a   :  { %v93_v1 = vunpack.c.0.s8 %v92_v0  ;;  %v94_v2 = vunpack.c.1.s8 %v92_v0  ;;  %v95_v3 = vunpack.c.2.s8 %v92_v0  ;;  %v96_v4 = vunpack.c.3.s8 %v92_v0  ;;  %v530_v5 = vld [vmem:[#allocation2] sm:$0xff]  ;;  %v78_v13 = vld [vmem:[#allocation2 + $0x10] sm:$0xff]  ;;  %v79_v14 = vld [vmem:[#allocation2 + $0x18] sm:$0xff]  ;;  %s250_s19 = sshll.u32 %s422_s18, 4  ;;  %s251_s19 = int_to_ptr.vmem [resolvable:$true] %s250_s19 }
  0x4b   :  { %v209_v11 = vand.u32 2147483647, %v530_v5  ;;  %v210_v12 = vand.u32 2147483647, %v532_v6  ;;  %v80_v19 = vld [vmem:[#allocation5] sm:$0xff]  ;;  %v81_v22 = vld [vmem:[#allocation5 + $0x8] sm:$0xff]  ;;  %p390_p5 = scmp.lt.s32.totalorder %s251_s19, %s251_s19 }
  0x4c   :  { %v534_v7 = vcvt.s32.f32 %v93_v1  ;;  %v536_v8 = vcvt.s32.f32 %v94_v2  ;;  %v538_v9 = vcvt.s32.f32 %v95_v3  ;;  %v540_v10 = vcvt.s32.f32 %v96_v4  ;;  %v82_v23 = vld [vmem:[#allocation5 + $0x10] sm:$0xff]  ;;  %v83_v24 = vld [vmem:[#allocation5 + $0x18] sm:$0xff]  ;;  %v84_v32 = vld [vmem:[#allocation7] sm:$0xff]  ;;  %s385_s20 = scalar_lea.vmem %s251_s19, 128 }
  0x4d   :  { %v211_v25 = vand.u32 2147483647, %v78_v13  ;;  %v212_v26 = vand.u32 2147483647, %v79_v14  ;;  %v113_v31 = vsub.f32 1.0, %v80_v19  ;;  %v114_v35 = vsub.f32 1.0, %v81_v22  ;;  %p386_p4 = scmp.ne.s32.totalorder %s251_s19, %s385_s20  ;;  %p391_p6 = scmp.lt.s32.totalorder %s385_s20, %s385_s20 }
  0x4e   :  { %vm101_vm0 = vcmp.gt.f32.partialorder %v534_v7, 0.0  ;;  %vm102_vm1 = vcmp.gt.f32.partialorder %v536_v8, 0.0  ;;  %vm103_vm2 = vcmp.gt.f32.partialorder %v538_v9, 0.0  ;;  %vm104_vm3 = vcmp.gt.f32.partialorder %v540_v10, 0.0  ;;  %v85_v37 = vld [vmem:[#allocation7 + $0x8] sm:$0xff]  ;;  %v86_v42 = vld [vmem:[#allocation7 + $0x10] sm:$0xff] }
  0x4f   :  { %v261_v16 = vsel %vm101_vm0, 1.0, %v421_v15  ;;  %v262_v17 = vsel %vm102_vm1, 1.0, %v421_v15  ;;  %v263_v18 = vsel %vm103_vm2, 1.0, %v421_v15  ;;  %v264_v20 = vsel %vm104_vm3, 1.0, %v421_v15  ;;  %v87_v43 = vld [vmem:[#allocation7 + $0x18] sm:$0xff]  ;;  %v88_v54 = vld [vmem:[#allocation8] sm:$0xff]  ;;  %p392_p7 = por %p391_p6, %p390_p5 }
  0x50   :  { %v197_v21 = vadd.f32 %v262_v17, %v261_v16  ;;  %v213_v27 = vsel %vm101_vm0, 0.0, %v209_v11  ;;  %v214_v28 = vsel %vm102_vm1, 0.0, %v210_v12  ;;  %v215_v33 = vsel %vm103_vm2, 0.0, %v211_v25  ;;  %v89_v57 = vld [vmem:[#allocation8 + $0x8] sm:$0xff]  ;;  %v90_v58 = vld [vmem:[#allocation8 + $0x10] sm:$0xff]  ;;  %v91_v59 = vld [vmem:[#allocation8 + $0x18] sm:$0xff] }
  0x51   :  { %v217_v30 = vadd.f32 %v214_v28, %v213_v27  ;;  %v216_v34 = vsel %vm104_vm3, 0.0, %v212_v26  ;;  %v115_v36 = vsub.f32 1.0, %v82_v23  ;;  %v116_v40 = vsub.f32 1.0, %v83_v24  ;;  %p393_p8 = pnand %p392_p7, %p386_p4 }
  0x52   :  { %v198_v29 = vadd.f32 %v263_v18, %v197_v21  ;;  %v117_v41 = vsel %vm101_vm0, %v80_v19, %v113_v31  ;;  %v118_v44 = vsel %vm102_vm1, %v81_v22, %v114_v35  ;;  %v145_v46 = vsub.f32 0.0, %v84_v32 }
  0x53   :  { %v218_v39 = vadd.f32 %v217_v30, %v215_v33  ;;  %v119_v45 = vsel %vm103_vm2, %v82_v23, %v115_v36  ;;  %281 = vlog2.f32 %v117_v41  ;;  %v120_v48 = vsel %vm104_vm3, %v83_v24, %v116_v40 }
  0x54   :  { %v199_v38 = vadd.f32 %v264_v20, %v198_v29  ;;  %283 = vlog2.f32 %v118_v44  ;;  %v146_v49 = vsub.f32 0.0, %v85_v37  ;;  %v147_v50 = vsub.f32 0.0, %v86_v42 }
  0x55   :  { %v219_v47 = vadd.f32 %v218_v39, %v216_v34  ;;  %285 = vlog2.f32 %v119_v45  ;;  %v148_v51 = vsub.f32 0.0, %v87_v43  ;;  %v149_v52 = vmul.f32 1.442695, %v145_v46 }
  0x56   :  { %200 = vadd.xlane.f32.xlu1 %v199_v38  ;;  %287 = vlog2.f32 %v120_v48  ;;  %v151_v53 = vmul.f32 1.442695, %v146_v49  ;;  %v153_v55 = vmul.f32 1.442695, %v147_v50  ;;  %v137_v60 = vsub.f32 %v530_v5, %v88_v54 }
  0x57   :  { %289 = vpow2.f32 %v149_v52  ;;  %v155_v56 = vmul.f32 1.442695, %v148_v51  ;;  %v138_v61 = vsub.f32 %v532_v6, %v89_v57  ;;  %v139_v62 = vsub.f32 %v78_v13, %v90_v58 }
  0x58   :  { %291 = vpow2.f32 %v151_v53  ;;  %v140_v0 = vsub.f32 %v79_v14, %v91_v59  ;;  %v141_v2 = vmul.f32 %v137_v60, %v137_v60  ;;  %v161_v19 = vmul.f32 0.5, %v84_v32 }
  0x59   :  { %293 = vpow2.f32 %v153_v55  ;;  %v142_v11 = vmul.f32 %v138_v61, %v138_v61  ;;  %v143_v16 = vmul.f32 %v139_v62, %v139_v62  ;;  %v162_v23 = vmul.f32 0.5, %v85_v37 }
  0x5a   :  { %220 = vadd.xlane.f32.xlu1 %v219_v47  ;;  %295 = vpow2.f32 %v155_v56  ;;  %v144_v21 = vmul.f32 %v140_v0, %v140_v0  ;;  %v163_v25 = vmul.f32 0.5, %v86_v42  ;;  %v164_v30 = vmul.f32 0.5, %v87_v43 }
  0x5d   :  { %v282_v63 = vpop.eup %281 }
  0x5e   :  { %v284_v1 = vpop.eup %283  ;;  %v122_v3 = vmul.f32 0.6931472, %v282_v63 }
  0x5f   :  { %v286_v4 = vpop.eup %285  ;;  %v124_v12 = vmul.f32 0.6931472, %v284_v1 }
  0x60   :  { %v288_v15 = vpop.eup %287  ;;  %v126_v17 = vmul.f32 0.6931472, %v286_v4  ;;  %v129_v18 = vmax.f32 %v122_v3, -100.0 }
  0x61   :  { %v290_v20 = vpop.eup %289  ;;  %v128_v5 = vmul.f32 0.6931472, %v288_v15  ;;  %v130_v22 = vmax.f32 %v124_v12, -100.0 }
  0x62   :  { %v292_v6 = vpop.eup %291  ;;  %v131_v13 = vmax.f32 %v126_v17, -100.0  ;;  %v133_v24 = vsub.f32 0.0, %v129_v18  ;;  %v157_v14 = vmul.f32 %v290_v20, %v141_v2  ;;  %v229_v18 = vlaneseq }
  0x63   :  { %v294_v26 = vpop.eup %293  ;;  %v132_v27 = vmax.f32 %v128_v5, -100.0  ;;  %v134_v28 = vsub.f32 0.0, %v130_v22  ;;  %v158_v29 = vmul.f32 %v292_v6, %v142_v11 }
  0x64   :  { %v296_v31 = vpop.eup %295  ;;  %v135_v33 = vsub.f32 0.0, %v131_v13  ;;  %v159_v34 = vmul.f32 %v294_v26, %v143_v16  ;;  %v165_v35 = vadd.f32 %v161_v19, %v157_v14  ;;  %v230_v19 = vshrl.u32 %v229_v18, 7 }
  0x65   :  { %v136_v32 = vsub.f32 0.0, %v132_v27  ;;  %v169_v36 = vadd.f32 %v134_v28, %v133_v24  ;;  %v160_v38 = vmul.f32 %v296_v31, %v144_v21  ;;  %v166_v39 = vadd.f32 %v162_v23, %v158_v29 }
  0x66   :  { %v167_v40 = vadd.f32 %v163_v25, %v159_v34  ;;  %v181_v37 = vsel %vm101_vm0, %v165_v35, 0.0  ;;  %vm234_vm4 = vcmp.eq.s32.totalorder %v230_v19, 3  ;;  %vm233_vm5 = vcmp.eq.s32.totalorder %v230_v19, 2 }
  0x67   :  { %v170_v41 = vadd.f32 %v169_v36, %v135_v33  ;;  %v168_v44 = vadd.f32 %v164_v30, %v160_v38  ;;  %v182_v42 = vsel %vm102_vm1, %v166_v39, 0.0  ;;  %vm232_vm6 = vcmp.eq.s32.totalorder %v230_v19, 1 }
  0x68   :  { %v183_v43 = vsel %vm103_vm2, %v167_v40, 0.0  ;;  %v185_v45 = vadd.f32 %v182_v42, %v181_v37  ;;  %vm231_vm7 = vcmp.eq.s32.totalorder %v230_v19, 0 }
  0x69   :  { %v171_v46 = vadd.f32 %v170_v41, %v136_v32  ;;  %v184_v47 = vsel %vm104_vm3, %v168_v44, 0.0 }
  0x6a   :  { %v186_v48 = vadd.f32 %v185_v45, %v183_v43 }
  0x6b   :  { %172 = vadd.xlane.f32.xlu0 %v171_v46 }
  0x6c   :  { %v187_v49 = vadd.f32 %v186_v48, %v184_v47 }
  0x6f   :  { %188 = vadd.xlane.f32.xlu0 %v187_v49 }
  0xe3   :  { %v201_v50 = vpop.xlane.xlu1 %200 }
  0xe4   :  { %v202_v51 = vrot.slane %v201_v50, 4 }
  0xe6   :  { %v203_v53 = vadd.f32 %v202_v51, %v201_v50 }
  0xe7   :  { %v221_v7 = vpop.xlane.xlu1 %220 }
  0xe8   :  { %v222_v52 = vrot.slane %v221_v7, 4  ;;  %v204_v9 = vrot.slane %v203_v53, 2 }
  0xea   :  { %v223_v8 = vadd.f32 %v222_v52, %v221_v7  ;;  %v205_v62 = vadd.f32 %v204_v9, %v203_v53 }
  0xec   :  { %v224_v58 = vrot.slane %v223_v8, 2  ;;  %v206_v4 = vrot.slane %v205_v62, 1 }
  0xee   :  { %v225_v63 = vadd.f32 %v224_v58, %v223_v8  ;;  %v207_v16 = vadd.f32 %v206_v4, %v205_v62 }
  0xf0   :  { %v226_v12 = vrot.slane %v225_v63, 1 }
  0xf2   :  { %v227_v17 = vadd.f32 %v226_v12, %v225_v63 }
  0xf8   :  { %v173_v54 = vpop.xlane.xlu0 %172 }
  0xf9   :  { %v174_v55 = vrot.slane %v173_v54, 4 }
  0xfb   :  { %v175_v56 = vadd.f32 %v174_v55, %v173_v54 }
  0xfc   :  { %v189_v57 = vpop.xlane.xlu0 %188 }
  0xfd   :  { %v176_v59 = vrot.slane %v175_v56, 2  ;;  %v190_v60 = vrot.slane %v189_v57, 4 }
  0xff   :  { %v191_v10 = vadd.f32 %v190_v60, %v189_v57  ;;  %v177_v61 = vadd.f32 %v176_v59, %v175_v56 }
 0x101   :  { %v192_v0 = vrot.slane %v191_v10, 2  ;;  %v178_v1 = vrot.slane %v177_v61, 1 }
 0x103   :  { %v193_v2 = vadd.f32 %v192_v0, %v191_v10  ;;  %v179_v3 = vadd.f32 %v178_v1, %v177_v61 }
 0x105   :  { %265 = vpush %v179_v3  ;;  %v194_v11 = vrot.slane %v193_v2, 1 }
 0x107   :  { %v195_v15 = vadd.f32 %v194_v11, %v193_v2 }
 0x109   :  { %267 = vpush %v195_v15 }
 0x10a   :  { %269 = vpush %v207_v16 }
 0x10b   :  { %271 = vpush %v227_v17 }
 0x136   :  { %s266_s3 = spop %265 }
 0x137   :  { %v241_v6 = vstv %s266_s3 }
 0x13a   :  { %s268_s4 = spop %267 }
 0x13b   :  { %s270_s30 = spop %269  ;;  %v239_v22 = vstv %s268_s4 }
 0x13c   :  { %v237_v20 = vstv %s270_s30  ;;  %s272_s6 = spop %271 }
 0x13d   :  { %v235_v21 = vstv %s272_s6 }
 0x13e   :  { %v236_v5 = vsel %vm234_vm4, %v235_v21, 0.0 }
 0x13f   :  { %v238_v23 = vsel %vm233_vm5, %v237_v20, %v236_v5 }
 0x140   :  { %v240_v13 = vsel %vm232_vm6, %v239_v22, %v238_v23 }
 0x141   :  { %v242_v24 = vsel %vm231_vm7, %v241_v6, %v240_v13 }
 0x142   :  { %243 = vst [vmem:[#allocation10] sm:$0xff] %v242_v24 }
 0x143   :  { %396 = shalt.err (!%p393_p8)
}
 0x144   :  { %s397_s24 = scalar_lea.hbm %s599_s5, 128 }
 0x145   :  { %p398_p9 = scmp.ne.s32.totalorder %s599_s5, %s397_s24  ;;  %p401_p10 = scmp.lt.u32.totalorder %s397_s24, %s599_s5 }
 0x147   :  { %p403_p11 = pnand %p401_p10, %p398_p9 }
 0x149   :  { %406 = shalt.err (!%p403_p11)
}
 0x14a   :  { %253 = dma.vmem_to_hbm [thread:$0]  %s251_s19, 128, %s599_s5, [#allocation4]  }
 0x14b   :  { %413 = dma.done.wait [#allocation4], 128  }
 0x14c   :  { %414 = vsyncadd [#allocation4], 4294967168 }
 0x14d   :  { %257 = vsyncpa [#allocation3], 1 }
 0x14e   :  { %258 = vsyncpa [#allocation6], 1 }
 0x14f   :  { %259 = vsyncpa [#allocation9], 1 }
 0x150   :  { %260 = vsyncpa [#allocation4], 1 }

</bundles_post_ra>
